<compile_context>
chip_gen: v6e
topology: v6e:2x2x1
jax: 0.10.0
libtpu: 0.0.40
codegen_flags: <defaults>
</compile_context>

<pallas_src>
import math
import functools

import jax
import jax.numpy as jnp
from jax import lax
from jax.experimental import pallas as pl
from jax.experimental.pallas import tpu as pltpu


def make_pe_table(d_model: int, max_len: int = 5000, dtype=jnp.float32) -> jnp.ndarray:
    """Sinusoidal PE table [max_len, d_model] (register_buffer analogue)."""
    position = jnp.arange(0, max_len, dtype=jnp.float32)[:, None]             # [max_len, 1]
    div_term = jnp.exp(
        jnp.arange(0, d_model, 2, dtype=jnp.float32) * (-math.log(10000.0) / d_model)
    )                                                                          # [d_model//2]
    pe = jnp.zeros((max_len, d_model), dtype=jnp.float32)
    pe = pe.at[:, 0::2].set(jnp.sin(position * div_term))
    pe = pe.at[:, 1::2].set(jnp.cos(position * div_term))
    return pe.astype(dtype)


def _dtype_sublane(dtype) -> int:
    # Native sublane packing: f32 -> 8 rows, bf16 -> 16, int8/fp8 -> 32.
    return {4: 8, 2: 16, 1: 32}.get(jnp.dtype(dtype).itemsize, 8)


def _choose_tile_rows(n_rows: int, row_bytes: int, dtype,
                      target_bytes: int = 4 << 20) -> int:
    """Rows per tile: multiple of the dtype sublane tile, ~target_bytes per
    streaming buffer, and (when possible) at least 2 grid steps so the
    double-buffer overlaps DMA with compute.  2x(x+out) + 2xpe stays well
    under a 32 MiB scoped-VMEM budget on every generation (incl. v7x)."""
    sub = _dtype_sublane(dtype)
    if n_rows <= sub:
        return n_rows                                     # full-extent block
    ts = max(sub, (target_bytes // max(row_bytes, 1)) // sub * sub)
    padded = -(-n_rows // sub) * sub
    ts = min(ts, padded)
    if ts >= n_rows:                                      # force >= 2 grid steps
        half = -(-n_rows // 2)
        ts = max(sub, -(-half // sub) * sub)
    return ts


def _fold_factor(S: int, BE: int, max_fold: int = 16) -> int:
    """Smallest k (dividing S, k <= max_fold) with (k*BE) % 128 == 0."""
    if BE % 128 == 0:
        return 1
    for cand in range(2, min(S, max_fold) + 1):
        if S % cand == 0 and (cand * BE) % 128 == 0:
            return cand
    return 1


def _pe_kernel(seed_ref, x_ref, pe_ref, o_ref, *, B, E, k, p, training):
    # x_ref/o_ref: [TS, k*B*E] tiles; pe_ref: [TS, k*E] compact PE rows.
    pe_blk = pe_ref[...].astype(jnp.float32)              # (ts, k*E)

    def batch_tile(piece):                                # (ts, E) -> (ts, B*E)
        return jnp.tile(piece, (1, B)) if B > 1 else piece

    if k == 1:
        pe_full = batch_tile(pe_blk)
    else:
        pe_full = jnp.concatenate(
            [batch_tile(pe_blk[:, j * E:(j + 1) * E]) for j in range(k)], axis=1)

    y = x_ref[...].astype(jnp.float32) + pe_full          # (ts, k*B*E)

    if training and p > 0.0:
        ts, lc = y.shape
        i = pl.program_id(0)
        row = lax.broadcasted_iota(jnp.int32, (ts, lc), 0)
        col = lax.broadcasted_iota(jnp.int32, (ts, lc), 1)
        flat = (i * ts + row) * lc + col                  # unique global element id
        # Counter-based hash (murmur3-style finalizer) of element id + seed.
        # Pure int32 VPU ops -> portable (interpret + Mosaic), tile-size invariant.
        h = flat ^ (seed_ref[0] * jnp.int32(0x27D4EB2F))
        h = h * jnp.int32(-1640531527)                    # 0x9E3779B9
        h = h ^ (h >> 15)
        h = h * jnp.int32(-2048144789)                    # 0x85EBCA6B
        h = h ^ (h >> 13)
        h = h * jnp.int32(-1028477387)                    # 0xC2B2AE35
        h = h ^ (h >> 16)
        r = h & jnp.int32(0x007FFFFF)                     # uniform 23-bit value
        threshold = jnp.int32(int(round(p * float(1 << 23))))
        keep = r >= threshold
        y = jnp.where(keep, y * jnp.float32(1.0 / (1.0 - p)), jnp.float32(0.0))

    o_ref[...] = y.astype(o_ref.dtype)


def positional_encoding(x: jnp.ndarray,
                        pe_table: jnp.ndarray,
                        *,
                        p: float = 0.1,
                        training: bool = False,
                        seed: int = 0) -> jnp.ndarray:
    """x: [S, B, E].  pe_table: [max_len, E] from make_pe_table.  Returns [S, B, E]."""
    S, B, E = x.shape
    assert pe_table.shape[1] == E, "pe_table must be [max_len, d_model]"
    assert pe_table.shape[0] >= S, "sequence longer than max_len"
    if training:
        assert 0.0 <= p < 1.0, "dropout p must be in [0, 1) for training"

    BE = B * E
    k = _fold_factor(S, BE)                    # fold k seq rows into lanes if BE % 128 != 0
    n_rows = S // k
    lc = k * BE

    x2 = x.reshape(n_rows, lc)                                       # free row-major view
    pe_fold = pe_table[:S].astype(x.dtype).reshape(n_rows, k * E)    # compact, row-folded

    ts = _choose_tile_rows(n_rows, lc * x.dtype.itemsize, x.dtype)
    grid = (pl.cdiv(n_rows, ts),)

    seed_arr = jnp.asarray([seed], dtype=jnp.int32)
    kernel = functools.partial(_pe_kernel, B=B, E=E, k=k,
                               p=float(p), training=bool(training))

    y2 = pl.pallas_call(
        kernel,
        out_shape=jax.ShapeDtypeStruct((n_rows, lc), x.dtype),
        grid_spec=pltpu.PrefetchScalarGridSpec(
            num_scalar_prefetch=1,                                   # seed -> SMEM
            grid=grid,
            in_specs=[
                pl.BlockSpec((ts, lc), lambda i, seed_ref: (i, 0)),      # x tile i
                pl.BlockSpec((ts, k * E), lambda i, seed_ref: (i, 0)),   # compact PE rows
            ],
            out_specs=pl.BlockSpec((ts, lc), lambda i, seed_ref: (i, 0)),
        ),
        compiler_params=pltpu.CompilerParams(
            dimension_semantics=("parallel",),      # independent tiles -> both TCs on v7x
            vmem_limit_bytes=32 * 1024 * 1024,      # v7x-safe (64 MiB VMEM/TC)
        ),
    )(seed_arr, x2, pe_fold)

    return y2.reshape(S, B, E)


if __name__ == "__main__":
    # Small shapes consistent with the module's forward: [seq, batch, d_model]
    S, B, E = 8, 2, 32
    max_len = 5000

    key = jax.random.PRNGKey(0)
    x = jax.random.normal(key, (S, B, E), dtype=jnp.float32)

    pe_table = make_pe_table(E, max_len=max_len, dtype=x.dtype)      # [max_len, E]

    # Independent plain-JAX reference: x + pe (broadcast over batch).
    position = jnp.arange(0, S, dtype=jnp.float32)[:, None]
    div_term = jnp.exp(jnp.arange(0, E, 2, dtype=jnp.float32) * (-math.log(10000.0) / E))
    pe_ref = jnp.zeros((S, E), dtype=jnp.float32)
    pe_ref = pe_ref.at[:, 0::2].set(jnp.sin(position * div_term))
    pe_ref = pe_ref.at[:, 1::2].set(jnp.cos(position * div_term))
    ref = x + pe_ref[:, None, :]

    # Eval mode (dropout = identity): deterministic, must match the reference.
    out = positional_encoding(x, pe_table, p=0.1, training=False)
    out = jax.block_until_ready(out)
    assert out.shape == (S, B, E)
    assert jnp.allclose(out, ref, atol=1e-6), "eval-mode mismatch vs reference"
    # PE buffer must be untouched by the call (no accidental aliasing/clobber).
    assert jnp.allclose(pe_table[:S], pe_ref, atol=1e-7), "pe_table was clobbered"

    # Training mode: inverted dropout -> every element is 0 or (x+pe)/(1-p).
    p = 0.1
    out_t = positional_encoding(x, pe_table, p=p, training=True, seed=1234)
    out_t = jax.block_until_ready(out_t)
    scale = 1.0 / (1.0 - p)
    two_valued = jnp.all((out_t == 0.0) | (jnp.abs(out_t - ref * scale) < 1e-5))
    n_drop = int(jnp.sum(out_t == 0.0))
    assert bool(two_valued), "training-mode values are not in {0, (x+pe)/(1-p)}"
    assert 0 < n_drop < out_t.size // 2, f"implausible drop count {n_drop}/{out_t.size}"

    print("KERNEL_OK")
</pallas_src>

<mosaic_0001>
module attributes {stable_mosaic.version = 11 : i64} {
  func.func @_pe_kernel(%arg0: i32, %arg1: memref<1xi32, #tpu.memory_space<smem>>, %arg2: memref<4x128xf32, #tpu.memory_space<vmem>>, %arg3: memref<4x64xf32, #tpu.memory_space<vmem>>, %arg4: memref<4x128xf32, #tpu.memory_space<vmem>>) attributes {dimension_semantics = [#tpu.dimension_semantics<parallel>], iteration_bounds = array<i64: 1>, scalar_prefetch = 1 : i64, scratch_operands = 0 : i64, tpu.core_type = #tpu.core_type<tc>, window_params = [{transform_indices = @transform_0, window_bounds = array<i64: 4, 128>}, {transform_indices = @transform_1, window_bounds = array<i64: 4, 64>}, {transform_indices = @transform_2, window_bounds = array<i64: 4, 128>}]} {
    %c0 = arith.constant 0 : index
    %c0_0 = arith.constant 0 : index
    %0 = vector.load %arg3[%c0, %c0_0] : memref<4x64xf32, #tpu.memory_space<vmem>>, vector<4x64xf32>
    %1 = vector.extract_strided_slice %0 {offsets = [0, 0], sizes = [4, 32], strides = [1, 1]} : vector<4x64xf32> to vector<4x32xf32>
    %2 = tpu.concatenate %1, %1 in 1 : vector<4x32xf32>, vector<4x32xf32> -> vector<4x64xf32>
    %3 = vector.extract_strided_slice %0 {offsets = [0, 32], sizes = [4, 32], strides = [1, 1]} : vector<4x64xf32> to vector<4x32xf32>
    %4 = tpu.concatenate %3, %3 in 1 : vector<4x32xf32>, vector<4x32xf32> -> vector<4x64xf32>
    %5 = tpu.concatenate %2, %4 in 1 : vector<4x64xf32>, vector<4x64xf32> -> vector<4x128xf32>
    %c0_1 = arith.constant 0 : index
    %c0_2 = arith.constant 0 : index
    %6 = vector.load %arg2[%c0_1, %c0_2] : memref<4x128xf32, #tpu.memory_space<vmem>>, vector<4x128xf32>
    %7 = arith.addf %6, %5 : vector<4x128xf32>
    %c0_3 = arith.constant 0 : index
    %c0_4 = arith.constant 0 : index
    %8 = vector.load %arg4[%c0_3, %c0_4] : memref<4x128xf32, #tpu.memory_space<vmem>>, vector<4x128xf32>
    tpu.vector_store %arg4[%c0_3, %c0_4], %7 {strides = array<i32>} : memref<4x128xf32, #tpu.memory_space<vmem>>, vector<4x128xf32>,
    return
  }
  func.func @transform_0(%arg0: i32, %arg1: memref<1xi32, #tpu.memory_space<smem>>) -> (i32, i32) {
    %c0_i32 = arith.constant 0 : i32
    %c0_i32_0 = arith.constant 0 : i32
    return %arg0, %c0_i32 : i32, i32
  }
  func.func @transform_1(%arg0: i32, %arg1: memref<1xi32, #tpu.memory_space<smem>>) -> (i32, i32) {
    %c0_i32 = arith.constant 0 : i32
    %c0_i32_0 = arith.constant 0 : i32
    return %arg0, %c0_i32 : i32, i32
  }
  func.func @transform_2(%arg0: i32, %arg1: memref<1xi32, #tpu.memory_space<smem>>) -> (i32, i32) {
    %c0_i32 = arith.constant 0 : i32
    %c0_i32_0 = arith.constant 0 : i32
    return %arg0, %c0_i32 : i32, i32
  }
}

</mosaic_0001>

<bundles_post_ra>
// kernel: tpu_custom_call.1
= control target key start
LH: loop header
LB: loop body
LE: loop exit
PB: predicated region body
PF: predicated region fallthrough
CT: control target
= control target key end

     0   :  { %9 = vsyncpa [#allocation5], 0  ;;  %s181_s0 = inlined_call_operand.<no memory space> [shape: s32[1], index: 0, kind: input, shape index: {}]   ;;  %s182_s1 = inlined_call_operand.hbm [shape: f32[4,128], index: 1, kind: input, shape index: {}]   ;;  %s183_s2 = inlined_call_operand.hbm [shape: f32[4,64], index: 2, kind: input, shape index: {}]   ;;  %s184_s3 = inlined_call_operand.hbm [shape: f32[4,128], index: 3, kind: output, shape index: {}]  }
   0x1   :  { %10 = vsyncpa [#allocation8], 0 }
   0x2   :  { %11 = vsyncpa [#allocation6], 0  ;;  %s146_s12 = smov [#allocation4]   ;;  %s147_s14 = smov [#allocation7]  }
   0x3   :  { %s18_s13 = sshll.u32 %s146_s12, 4  ;;  %s28_s15 = sshll.u32 %s147_s14, 4  ;;  %s19_s13 = int_to_ptr.vmem [resolvable:$true] %s18_s13  ;;  %s29_s15 = int_to_ptr.vmem [resolvable:$true] %s28_s15 }
   0x4   :  { %s88_s16 = scalar_lea.vmem %s19_s13, 64  ;;  %p93_p1 = scmp.lt.s32.totalorder %s19_s13, %s19_s13 }
   0x5   :  { %p89_p0 = scmp.ne.s32.totalorder %s19_s13, %s88_s16  ;;  %p94_p2 = scmp.lt.s32.totalorder %s88_s16, %s88_s16 }
   0x7   :  { %p95_p3 = por %p94_p2, %p93_p1 }
   0x9   :  { %p96_p4 = pnand %p95_p3, %p89_p0 }
   0xb   :  { %99 = shalt.err (!%p96_p4)
}
   0xc   :  { %21 = dma.hbm_to_vmem [thread:$0]  %s182_s1, 64, %s19_s13, [#allocation5]  }
   0xd   :  { %s108_s18 = scalar_lea.vmem %s29_s15, 64  ;;  %p113_p6 = scmp.lt.s32.totalorder %s29_s15, %s29_s15 }
   0xe   :  { %p109_p5 = scmp.ne.s32.totalorder %s29_s15, %s108_s18  ;;  %p114_p7 = scmp.lt.s32.totalorder %s108_s18, %s108_s18 }
  0x10   :  { %p115_p8 = por %p114_p7, %p113_p6 }
  0x12   :  { %p116_p9 = pnand %p115_p8, %p109_p5 }
  0x14   :  { %119 = shalt.err (!%p116_p9)
}
  0x15   :  { %31 = dma.hbm_to_vmem [thread:$0]  %s183_s2, 64, %s29_s15, [#allocation8]  }
  0x16   :  { %140 = dma.done.wait [#allocation5], 64  }
  0x17   :  { %141 = vsyncadd [#allocation5], 4294967232 }
  0x18   :  { %142 = dma.done.wait [#allocation8], 64  }
  0x19   :  { %143 = vsyncadd [#allocation8], 4294967232  ;;  %v38_v0 = vld [vmem:[#allocation7] sm:$0xf]  ;;  %s148_s21 = smov 96   ;;  %s149_s22 = smov 32  }
  0x1a   :  { %45 = vrot.lane.b32.xlu0 %v38_v0, %s148_s21  ;;  %vm43_vm0 = vcmask 261120   ;;  %s150_s1 = smov 64   ;;  %vm53_vm1 = vcmask 523264   ;;  %v55_v5 = vld [vmem:[#allocation4] sm:$0xf]  ;;  %s151_s23 = smov [#allocation9]  }
  0x1b   :  { %s64_s2 = sshll.u32 %s151_s23, 4  ;;  %s65_s2 = int_to_ptr.vmem [resolvable:$true] %s64_s2 }
  0x1c   :  { %s120_s24 = scalar_lea.vmem %s65_s2, 64  ;;  %p125_p11 = scmp.lt.s32.totalorder %s65_s2, %s65_s2 }
  0x1d   :  { %p121_p10 = scmp.ne.s32.totalorder %s65_s2, %s120_s24  ;;  %p126_p12 = scmp.lt.s32.totalorder %s120_s24, %s120_s24 }
  0x1e   :  { %40 = vrot.lane.b32.xlu0 %v38_v0, %s149_s22 }
  0x1f   :  { %p127_p13 = por %p126_p12, %p125_p11 }
  0x21   :  { %p128_p0 = pnand %p127_p13, %p121_p10 }
  0x8c   :  { %v46_v1 = vpop.permute.xlu0 %45 }
  0x8d   :  { %v48_v2 = vsel %vm43_vm0, %v46_v1, %v38_v0 }
  0x8e   :  { %50 = vrot.lane.b32.xlu1 %v48_v2, %s150_s1 }
  0x90   :  { %v41_v3 = vpop.permute.xlu0 %40 }
  0x91   :  { %v44_v4 = vsel %vm43_vm0, %v38_v0, %v41_v3 }
 0x100   :  { %v51_v6 = vpop.permute.xlu1 %50 }
 0x101   :  { %v54_v7 = vsel %vm53_vm1, %v44_v4, %v51_v6 }
 0x102   :  { %v56_v8 = vadd.f32 %v55_v5, %v54_v7 }
 0x104   :  { %57 = vst [vmem:[#allocation9] sm:$0xf] %v56_v8 }
 0x105   :  { %131 = shalt.err (!%p128_p0)
}
 0x106   :  { %67 = dma.vmem_to_hbm [thread:$0]  %s65_s2, 64, %s184_s3, [#allocation6]  }
 0x107   :  { %144 = dma.done.wait [#allocation6], 64  }
 0x108   :  { %145 = vsyncadd [#allocation6], 4294967232 }
 0x109   :  { %71 = vsyncpa [#allocation5], 1 }
 0x10a   :  { %72 = vsyncpa [#allocation8], 1 }
 0x10b   :  { %73 = vsyncpa [#allocation6], 1 }

</bundles_post_ra>
